<compile_context>
chip_gen: v7x
topology: tpu7x:2x2x1
jax: 0.10.0
libtpu: 0.0.40
codegen_flags: <defaults>
</compile_context>

<pallas_src>
import math

import jax
import jax.numpy as jnp
from jax.experimental import pallas as pl
from jax.experimental.pallas import tpu as pltpu

_HALF_LOG_2PI = 0.5 * math.log(2.0 * math.pi)


def _log_prob_kernel(params_ref, x_ref, o_ref):
    # params_ref: (2, D) resident f32 block; row 0 = mu, row 1 = sigma.
    # x_ref: (tile_b, D) streaming block in the caller's dtype; o_ref: f32.
    p = params_ref[...]
    mu = p[0:1, :]
    sigma = p[1:2, :]
    inv_sigma = 1.0 / sigma                              # tiny (1, D) -> EUP, ~free
    c = -jnp.log(sigma) - _HALF_LOG_2PI                  # tiny (1, D) -> EUP, ~free
    z = (x_ref[...].astype(jnp.float32) - mu) * inv_sigma
    o_ref[...] = c - 0.5 * (z * z)


def _device_defaults():
    """(target_block_bytes, tensorcores_per_device) from the local TPU generation."""
    kind = ""
    try:
        dev = jax.devices()[0]
        kind = (getattr(dev, "device_kind", "") or "").lower()
    except Exception:
        pass
    if "v7" in kind:
        # 4 MiB blocks: x+out double-buffered ~= 16 MiB << 32 MiB scoped VMEM,
        # and big enough to hide the ~0.35 us/step overhead at 3.2 TB/s HBM.
        return 4 << 20, 2
    # v6e measured knee ~1 MiB; also safe under v5e's 16 MiB default scoped VMEM.
    return 1 << 20, 1


def _choose_tile_b(B, D, x_itemsize, target_block_bytes, num_cores):
    """Pick a sublane-aligned row tile ~target_block_bytes, balanced across TCs."""
    mult = max(8, 32 // max(int(x_itemsize), 1))   # 8 for f32, 16 for bf16, 32 for i8
    bytes_per_row = max(D, 1) * 4                  # f32 output dominates traffic
    rows = max(mult, (target_block_bytes // bytes_per_row) // mult * mult)
    b_al = pl.cdiv(B, mult) * mult
    rows = min(rows, b_al)
    steps = pl.cdiv(B, rows)
    # Prefer a step count that's a multiple of the TC count (megacore balance),
    # whenever the batch is large enough to split.
    if num_cores > 1 and steps % num_cores != 0 and b_al >= mult * num_cores:
        steps = pl.cdiv(steps, num_cores) * num_cores
        rows = min(b_al, max(mult, pl.cdiv(pl.cdiv(B, steps), mult) * mult))
    return rows


def gaussian_log_prob(x, mu, sigma, *, tile_b=None, target_block_bytes=None):
    """x: [B, D] (any float dtype) or [D]; mu, sigma: [D] f32 params.
    Returns elementwise log-probs as f32 with the same leading shape as x."""
    x = jnp.asarray(x)                                   # keep native dtype; cast in-kernel
    mu = jnp.asarray(mu, jnp.float32).reshape(-1)
    sigma = jnp.asarray(sigma, jnp.float32).reshape(-1)

    squeeze = x.ndim == 1
    if squeeze:
        x = x[None, :]
    B, D = x.shape
    assert mu.shape == (D,) and sigma.shape == (D,), "mu/sigma must have shape [D]"

    tbb_default, num_cores = _device_defaults()
    if target_block_bytes is None:
        target_block_bytes = tbb_default
    if tile_b is None:
        tile_b = _choose_tile_b(B, D, x.dtype.itemsize, target_block_bytes, num_cores)
    assert tile_b % 8 == 0, "tile_b must be a multiple of 8"

    params = jnp.stack([mu, sigma])                      # (2, D) single resident input

    grid = (pl.cdiv(B, tile_b),)                         # ragged last block is masked by Pallas
    out = pl.pallas_call(
        _log_prob_kernel,
        out_shape=jax.ShapeDtypeStruct((B, D), jnp.float32),
        grid_spec=pltpu.PrefetchScalarGridSpec(
            num_scalar_prefetch=0,
            grid=grid,
            in_specs=[
                pl.BlockSpec((2, D), lambda i: (0, 0)),        # mu/sigma (resident)
                pl.BlockSpec((tile_b, D), lambda i: (i, 0)),   # x tile (native dtype)
            ],
            out_specs=pl.BlockSpec((tile_b, D), lambda i: (i, 0)),
        ),
        compiler_params=pltpu.CompilerParams(
            dimension_semantics=("parallel",),
        ),
    )(params, x)

    return out[0] if squeeze else out


# TODO(synk): GaussianPolicy.sample() (RNG draw) and .entropy() (closed-form,
# data-independent) are not part of forward(); only forward (log_prob) is a kernel.


def _reference_log_prob(x, mu, sigma):
    return (
        -0.5 * ((x - mu[None, :]) / sigma[None, :]) ** 2
        - jnp.log(sigma)[None, :]
        - _HALF_LOG_2PI
    )


if __name__ == "__main__":
    key = jax.random.PRNGKey(0)
    kx, kmu, ksig, kx2, kx3 = jax.random.split(key, 5)

    # Lane-aligned small shape: D=128, B=16.
    B, D = 16, 128
    x = jax.random.normal(kx, (B, D), dtype=jnp.float32)
    mu = 0.1 * jax.random.normal(kmu, (D,), dtype=jnp.float32)
    sigma = 0.5 + jax.nn.softplus(jax.random.normal(ksig, (D,), dtype=jnp.float32))

    out = jax.block_until_ready(gaussian_log_prob(x, mu, sigma))
    ref = _reference_log_prob(x, mu, sigma)
    assert out.shape == (B, D) and out.dtype == jnp.float32
    assert jnp.allclose(out, ref, atol=1e-5, rtol=1e-5), "mismatch vs reference"

    # Unaligned shape (B=10, D=5): no padding, ragged block + masked lane tail.
    B2, D2 = 10, 5
    x2 = jax.random.normal(kx2, (B2, D2), dtype=jnp.float32)
    out2 = jax.block_until_ready(gaussian_log_prob(x2, mu[:D2], sigma[:D2]))
    ref2 = _reference_log_prob(x2, mu[:D2], sigma[:D2])
    assert out2.shape == (B2, D2)
    assert jnp.allclose(out2, ref2, atol=1e-5, rtol=1e-5), "mismatch vs reference (unaligned)"

    # bf16 input path: streamed as bf16, cast to f32 inside the kernel.
    x3 = jax.random.normal(kx3, (B, D), dtype=jnp.bfloat16)
    out3 = jax.block_until_ready(gaussian_log_prob(x3, mu, sigma))
    ref3 = _reference_log_prob(x3.astype(jnp.float32), mu, sigma)
    assert out3.shape == (B, D) and out3.dtype == jnp.float32
    assert jnp.allclose(out3, ref3, atol=1e-2, rtol=1e-2), "mismatch vs reference (bf16)"

    print("KERNEL_OK")
</pallas_src>

<mosaic_0001>
module attributes {stable_mosaic.version = 11 : i64} {
  func.func @_log_prob_kernel(%arg0: i32, %arg1: memref<2x128xf32, #tpu.memory_space<vmem>>, %arg2: memref<16x128xf32, #tpu.memory_space<vmem>>, %arg3: memref<16x128xf32, #tpu.memory_space<vmem>>) attributes {dimension_semantics = [#tpu.dimension_semantics<parallel>], iteration_bounds = array<i64: 1>, scalar_prefetch = 0 : i64, scratch_operands = 0 : i64, tpu.core_type = #tpu.core_type<tc>, window_params = [{pipeline_mode = #tpu.pipeline_mode<synchronous>, transform_indices = @transform_0, window_bounds = array<i64: 2, 128>}, {transform_indices = @transform_1, window_bounds = array<i64: 16, 128>}, {transform_indices = @transform_2, window_bounds = array<i64: 16, 128>}]} {
    %c0 = arith.constant 0 : index
    %c0_0 = arith.constant 0 : index
    %0 = vector.load %arg1[%c0, %c0_0] : memref<2x128xf32, #tpu.memory_space<vmem>>, vector<2x128xf32>
    %1 = vector.extract_strided_slice %0 {offsets = [0, 0], sizes = [1, 128], strides = [1, 1]} : vector<2x128xf32> to vector<1x128xf32>
    %2 = vector.extract_strided_slice %0 {offsets = [1, 0], sizes = [1, 128], strides = [1, 1]} : vector<2x128xf32> to vector<1x128xf32>
    %cst = arith.constant 1.000000e+00 : f32
    %3 = vector.broadcast %cst : f32 to vector<1x128xf32>
    %4 = arith.divf %3, %2 : vector<1x128xf32>
    %5 = math.log %2 : vector<1x128xf32>
    %cst_1 = arith.constant 0.000000e+00 : f32
    %6 = vector.broadcast %cst_1 : f32 to vector<1x128xf32>
    %7 = arith.subf %6, %5 : vector<1x128xf32>
    %cst_2 = arith.constant 0.918938517 : f32
    %8 = vector.broadcast %cst_2 : f32 to vector<1x128xf32>
    %9 = arith.subf %7, %8 : vector<1x128xf32>
    %c0_3 = arith.constant 0 : index
    %c0_4 = arith.constant 0 : index
    %10 = vector.load %arg2[%c0_3, %c0_4] : memref<16x128xf32, #tpu.memory_space<vmem>>, vector<16x128xf32>
    %11 = vector.broadcast %1 : vector<1x128xf32> to vector<16x128xf32>
    %12 = arith.subf %10, %11 : vector<16x128xf32>
    %13 = vector.broadcast %4 : vector<1x128xf32> to vector<16x128xf32>
    %14 = arith.mulf %12, %13 : vector<16x128xf32>
    %15 = arith.mulf %14, %14 : vector<16x128xf32>
    %cst_5 = arith.constant 5.000000e-01 : f32
    %16 = vector.broadcast %cst_5 : f32 to vector<16x128xf32>
    %17 = arith.mulf %16, %15 : vector<16x128xf32>
    %18 = vector.broadcast %9 : vector<1x128xf32> to vector<16x128xf32>
    %19 = arith.subf %18, %17 : vector<16x128xf32>
    %c0_6 = arith.constant 0 : index
    %c0_7 = arith.constant 0 : index
    %20 = vector.load %arg3[%c0_6, %c0_7] : memref<16x128xf32, #tpu.memory_space<vmem>>, vector<16x128xf32>
    tpu.vector_store %arg3[%c0_6, %c0_7], %19 {strides = array<i32>} : memref<16x128xf32, #tpu.memory_space<vmem>>, vector<16x128xf32>,
    return
  }
  func.func @transform_0(%arg0: i32) -> (i32, i32) {
    %c0_i32 = arith.constant 0 : i32
    %c0_i32_0 = arith.constant 0 : i32
    %c0_i32_1 = arith.constant 0 : i32
    return %c0_i32, %c0_i32_0 : i32, i32
  }
  func.func @transform_1(%arg0: i32) -> (i32, i32) {
    %c0_i32 = arith.constant 0 : i32
    %c0_i32_0 = arith.constant 0 : i32
    return %arg0, %c0_i32 : i32, i32
  }
  func.func @transform_2(%arg0: i32) -> (i32, i32) {
    %c0_i32 = arith.constant 0 : i32
    %c0_i32_0 = arith.constant 0 : i32
    return %arg0, %c0_i32 : i32, i32
  }
}

</mosaic_0001>

<bundles_post_ra>
// kernel: tpu_custom_call.1
= control target key start
LH: loop header
LB: loop body
LE: loop exit
PB: predicated region body
PF: predicated region fallthrough
CT: control target
= control target key end

     0   :  { %7 = vsyncpa [#allocation3], 0  ;;  %s240_s0 = inlined_call_operand.hbm [shape: f32[2,128], index: 0, kind: input, shape index: {}]   ;;  %s241_s1 = inlined_call_operand.hbm [shape: f32[16,128], index: 1, kind: input, shape index: {}]   ;;  %s242_s2 = inlined_call_operand.hbm [shape: f32[16,128], index: 2, kind: output, shape index: {}]  }
   0x1   :  { %8 = vsyncpa [#allocation6], 0 }
   0x2   :  { %9 = vsyncpa [#allocation4], 0  ;;  %s171_s9 = smov [#allocation2]   ;;  %s172_s11 = smov [#allocation5]  }
   0x3   :  { %s16_s10 = sshll.u32 %s171_s9, 4  ;;  %s25_s12 = sshll.u32 %s172_s11, 4  ;;  %s17_s10 = int_to_ptr.vmem [resolvable:$true] %s16_s10  ;;  %s191_s12 = int_to_ptr.vmem [resolvable:$true] %s25_s12 }
   0x4   :  { %s99_s15 = scalar_lea.hbm %s240_s0, 32 }
   0x5   :  { %p100_p0 = scmp.ne.s32.totalorder %s240_s0, %s99_s15  ;;  %p103_p1 = scmp.lt.u32.totalorder %s99_s15, %s240_s0 }
   0x7   :  { %p105_p2 = pnand %p103_p1, %p100_p0 }
   0x9   :  { %108 = shalt.err (!%p105_p2)
}
   0xa   :  { %s109_s20 = scalar_lea.vmem %s17_s10, 32  ;;  %p114_p4 = scmp.lt.s32.totalorder %s17_s10, %s17_s10 }
   0xb   :  { %p110_p3 = scmp.ne.s32.totalorder %s17_s10, %s109_s20  ;;  %p115_p5 = scmp.lt.s32.totalorder %s109_s20, %s109_s20 }
   0xd   :  { %p116_p6 = por %p115_p5, %p114_p4 }
   0xf   :  { %p117_p7 = pnand %p116_p6, %p110_p3 }
  0x11   :  { %120 = shalt.err (!%p117_p7)
}
  0x12   :  { %19 = dma.hbm_to_vmem [thread:$0]  %s240_s0, 32, %s17_s10, [#allocation3]  }
  0x13   :  { %s121_s25 = scalar_lea.hbm %s241_s1, 256 }
  0x14   :  { %p122_p8 = scmp.ne.s32.totalorder %s241_s1, %s121_s25  ;;  %p125_p9 = scmp.lt.u32.totalorder %s121_s25, %s241_s1 }
  0x16   :  { %p127_p10 = pnand %p125_p9, %p122_p8 }
  0x18   :  { %130 = shalt.err (!%p127_p10)
}
  0x19   :  { %s131_s30 = scalar_lea.vmem %s191_s12, 256  ;;  %p136_p12 = scmp.lt.s32.totalorder %s191_s12, %s191_s12 }
  0x1a   :  { %p132_p11 = scmp.ne.s32.totalorder %s191_s12, %s131_s30  ;;  %p137_p13 = scmp.lt.s32.totalorder %s131_s30, %s131_s30 }
  0x1c   :  { %p138_p0 = por %p137_p13, %p136_p12 }
  0x1e   :  { %p139_p1 = pnand %p138_p0, %p132_p11 }
  0x20   :  { %142 = shalt.err (!%p139_p1)
}
  0x21   :  { %s173_s0 = smov 128   ;;  %s174_s3 = smov 8  }
  0x22   :  { %31 = dma.hbm_to_vmem [thread:$0]  %s241_s1, 256, %s191_s12, [#allocation6], %s173_s0, %s173_s0, %s174_s3  }
  0x23   :  { %165 = dma.done.wait [#allocation3], 32  }
  0x24   :  { %166 = vsyncadd [#allocation3], 4294967264 }
  0x25   :  { %167 = dma.done.wait [#allocation6], 256  }
  0x26   :  { %168 = vsyncadd [#allocation6], 4294967040  ;;  %v47_v0 = vlaneseq  ;;  %v38_v2 = vld [vmem:[#allocation2] sm:$0x3]  ;;  %v45_v5 = vld [vmem:[#allocation5] sm:$0xff]  ;;  %s175_s1 = smov [#allocation7]  }
  0x27   :  { %95 = vrcp.f32 %v38_v2  ;;  %v46_v6 = vld [vmem:[#allocation5 + $0x8] sm:$0xff]  ;;  %s76_s6 = sshll.u32 %s175_s1, 4  ;;  %s77_s6 = int_to_ptr.vmem [resolvable:$true] %s76_s6 }
  0x28   :  { %v48_v1 = vshrl.u32 %v47_v0, 7  ;;  %97 = vlog2.f32 %v38_v2  ;;  %s143_s7 = scalar_lea.vmem %s77_s6, 256  ;;  %p148_p3 = scmp.lt.s32.totalorder %s77_s6, %s77_s6 }
  0x29   :  { %p144_p2 = scmp.ne.s32.totalorder %s77_s6, %s143_s7  ;;  %p149_p4 = scmp.lt.s32.totalorder %s143_s7, %s143_s7 }
  0x2a   :  { %v49_v3 = vsub.s32 0, %v48_v1  ;;  %v55_v7 = vsub.s32 1, %v48_v1 }
  0x2b   :  { %p150_p5 = por %p149_p4, %p148_p3 }
  0x2c   :  { %v50_v4 = vrot.slane %v38_v2, %v49_v3 }
  0x2d   :  { %p151_p6 = pnand %p150_p5, %p144_p2 }
  0x2e   :  { %v51_v8 = vsub.f32 %v45_v5, %v50_v4  ;;  %v52_v9 = vsub.f32 %v46_v6, %v50_v4 }
  0x31   :  { %v96_v10 = vpop.eup %95 }
  0x32   :  { %v98_v11 = vpop.eup %97  ;;  %v56_v12 = vrot.slane %v96_v10, %v55_v7 }
  0x33   :  { %v42_v13 = vmul.f32 0.6931472, %v98_v11 }
  0x34   :  { %v57_v14 = vmul.f32 %v56_v12, %v51_v8  ;;  %v58_v15 = vmul.f32 %v56_v12, %v52_v9 }
  0x35   :  { %v43_v16 = vsub.f32 0.0, %v42_v13 }
  0x36   :  { %v59_v17 = vmul.f32 %v57_v14, %v57_v14  ;;  %v60_v18 = vmul.f32 %v58_v15, %v58_v15 }
  0x37   :  { %v89_v19 = vadd.f32 -0.9189385, %v43_v16 }
  0x38   :  { %v61_v20 = vmul.f32 0.5, %v59_v17  ;;  %v62_v21 = vmul.f32 0.5, %v60_v18 }
  0x39   :  { %v66_v22 = vrot.slane %v89_v19, %v55_v7 }
  0x3b   :  { %v67_v23 = vsub.f32 %v66_v22, %v61_v20  ;;  %v68_v24 = vsub.f32 %v66_v22, %v62_v21 }
  0x3d   :  { %69 = vst [vmem:[#allocation7] sm:$0xff] %v67_v23  ;;  %70 = vst [vmem:[#allocation7 + $0x8] sm:$0xff] %v68_v24 }
  0x3e   :  { %154 = shalt.err (!%p151_p6)
}
  0x3f   :  { %s155_s10 = scalar_lea.hbm %s242_s2, 256 }
  0x40   :  { %p156_p7 = scmp.ne.s32.totalorder %s242_s2, %s155_s10  ;;  %p159_p8 = scmp.lt.u32.totalorder %s155_s10, %s242_s2 }
  0x42   :  { %p161_p9 = pnand %p159_p8, %p156_p7 }
  0x44   :  { %164 = shalt.err (!%p161_p9)
}
  0x45   :  { %82 = dma.vmem_to_hbm [thread:$0]  %s77_s6, 256, %s242_s2, [#allocation4], %s173_s0, %s173_s0, %s174_s3  }
  0x46   :  { %169 = dma.done.wait [#allocation4], 256  }
  0x47   :  { %170 = vsyncadd [#allocation4], 4294967040 }
  0x48   :  { %86 = vsyncpa [#allocation3], 1 }
  0x49   :  { %87 = vsyncpa [#allocation6], 1 }
  0x4a   :  { %88 = vsyncpa [#allocation4], 1 }

</bundles_post_ra>
